<compile_context>
chip_gen: v6e
topology: v6e:2x2x1
jax: 0.10.0
libtpu: 0.0.40
codegen_flags: <defaults>
</compile_context>

<pallas_src>
import jax
import jax.numpy as jnp
from jax.experimental import pallas as pl
from jax.experimental.pallas import tpu as pltpu


_VMEM_LIMIT_BYTES = 48 * 1024 * 1024   # fits v7x's 64 MiB physical VMEM; ample on v5e/v6e
_TILE_BUDGET_BYTES = 24 * 1024 * 1024  # double-buffered inputs + f32 temporaries
_MAX_TM = 1024                         # diminishing returns past ~512-1024 rows


def _vae_loss_kernel(dec_ref, y_ref, mu_ref, lv_ref, ce_ref, kld_ref):
    # ---- reconstruction term: per-row sum of  -y * log_softmax(dec, -1) ----
    x = dec_ref[...].astype(jnp.float32)
    y = y_ref[...].astype(jnp.float32)
    m = jnp.max(x, axis=-1, keepdims=True)
    shifted = x - m
    lse = jnp.log(jnp.sum(jnp.exp(shifted), axis=-1, keepdims=True))
    log_sm = shifted - lse
    ce_ref[...] = jnp.sum(-y * log_sm, axis=-1, keepdims=True)

    # ---- KL term: per-row sum of 0.5 * (-logvar + exp(logvar) + mu^2 - 1) ----
    lv = lv_ref[...].astype(jnp.float32)
    mu = mu_ref[...].astype(jnp.float32)
    kld_ref[...] = jnp.sum(0.5 * (-lv + jnp.exp(lv) + mu * mu - 1.0),
                           axis=-1, keepdims=True)


def _choose_tile(R, V, L, dtypes):
    """Largest row-tile that fits the VMEM budget (per-generation safe)."""
    itemsizes = [jnp.dtype(d).itemsize for d in dtypes]
    # sublane packing requirement: f32 -> 8 rows, bf16 -> 16, int8/bool -> 32
    packing = max(max(32 // it for it in itemsizes), 8)
    # bytes per tile row: 2x (double-buffered) native-dtype inputs
    # + ~4 f32 temporaries over V (shifted/exp/log_sm/contrib) + 2 over L.
    per_row = (2 * (itemsizes[0] * V + itemsizes[1] * V
                    + itemsizes[2] * L + itemsizes[3] * L)
               + 4 * 4 * V + 2 * 4 * L)
    tm = max(packing, _TILE_BUDGET_BYTES // per_row)
    tm = min(tm, _MAX_TM)
    tm = min(tm, -(-R // packing) * packing)   # never bigger than (padded) R
    tm = max(packing, (tm // packing) * packing)
    return int(tm)


def vae_loss(decoder_output, mu_q, logvar_q, y_true_s, anneal, batch_size):
    B, S, V = decoder_output.shape
    L = mu_q.shape[-1]
    R = B * S

    dec = decoder_output.reshape(R, V)          # native dtype; cast in-kernel
    y = y_true_s.reshape(R, V)
    mu = mu_q.reshape(R, L)
    lv = logvar_q.reshape(R, L)

    # num_ones = sum(y_true_s[0, 0]) -- trivially cheap; done in XLA so the grid
    # stays fully data-parallel and no grid step carries a special role.
    num_ones = jnp.sum(y_true_s[0, 0]).astype(jnp.float32)

    tm = _choose_tile(R, V, L, [dec.dtype, y.dtype, mu.dtype, lv.dtype])
    num_tiles = -(-R // tm)
    R_pad = num_tiles * tm
    if R_pad > R:
        # zero-padded rows contribute exactly 0 to both partial sums
        pad = ((0, R_pad - R), (0, 0))
        dec, y, mu, lv = (jnp.pad(a, pad) for a in (dec, y, mu, lv))

    row_spec_v = pl.BlockSpec((tm, V), lambda i: (i, 0))
    row_spec_l = pl.BlockSpec((tm, L), lambda i: (i, 0))
    out_spec = pl.BlockSpec((tm, 1), lambda i: (i, 0))

    cost = pl.CostEstimate(
        flops=int(6 * R_pad * V + 6 * R_pad * L),
        transcendentals=int(R_pad * V + R_pad * L),
        bytes_accessed=int(dec.size * jnp.dtype(dec.dtype).itemsize
                           + y.size * jnp.dtype(y.dtype).itemsize
                           + mu.size * jnp.dtype(mu.dtype).itemsize
                           + lv.size * jnp.dtype(lv.dtype).itemsize
                           + 2 * R_pad * 4),
    )

    ce_rows, kld_rows = pl.pallas_call(
        _vae_loss_kernel,
        out_shape=(jax.ShapeDtypeStruct((R_pad, 1), jnp.float32),
                   jax.ShapeDtypeStruct((R_pad, 1), jnp.float32)),
        grid=(num_tiles,),
        in_specs=[row_spec_v, row_spec_v, row_spec_l, row_spec_l],
        out_specs=(out_spec, out_spec),
        compiler_params=pltpu.CompilerParams(
            dimension_semantics=("parallel",),       # megacore-sharded on v7x
            vmem_limit_bytes=_VMEM_LIMIT_BYTES),
        cost_estimate=cost,
    )(dec, y, mu, lv)

    kld_mean = jnp.sum(kld_rows) / jnp.float32(R)
    likelihood = jnp.sum(ce_rows) / (jnp.float32(batch_size) * num_ones)
    return jnp.float32(anneal) * kld_mean + likelihood


def vae_loss_ref(decoder_output, mu_q, logvar_q, y_true_s, anneal, batch_size):
    """Pure-JAX reference mirroring the PyTorch forward."""
    kld = jnp.mean(jnp.sum(
        0.5 * (-logvar_q + jnp.exp(logvar_q) + mu_q ** 2 - 1.0), -1))
    B, S, V = decoder_output.shape
    log_sm = jax.nn.log_softmax(decoder_output, -1)
    num_ones = jnp.sum(y_true_s[0, 0])
    likelihood = jnp.sum(
        -1.0 * y_true_s.reshape(B * S, -1) * log_sm.reshape(B * S, -1)
    ) / (float(batch_size) * num_ones)
    return anneal * kld + likelihood


if __name__ == "__main__":
    # Small shapes consistent with the SVAE forward:
    #   decoder_output: (batch, seq, num_items), mu/logvar: (batch, seq, latent)
    B, S, V, L = 2, 8, 128, 32
    hyper_params = {"batch_size": B}
    anneal = 0.2

    key = jax.random.PRNGKey(0)
    k1, k2, k3, k4 = jax.random.split(key, 4)
    decoder_output = jax.random.normal(k1, (B, S, V), dtype=jnp.float32)
    mu_q = jax.random.normal(k2, (B, S, L), dtype=jnp.float32) * 0.5
    logvar_q = jax.random.normal(k3, (B, S, L), dtype=jnp.float32) * 0.1
    # multi-hot targets (0/1), guaranteed at least a few ones in y[0, 0]
    y_true_s = (jax.random.uniform(k4, (B, S, V)) < 0.1).astype(jnp.float32)
    y_true_s = y_true_s.at[0, 0, :4].set(1.0)

    out = vae_loss(decoder_output, mu_q, logvar_q, y_true_s, anneal,
                   hyper_params["batch_size"])
    out = jax.block_until_ready(out)

    ref = vae_loss_ref(decoder_output, mu_q, logvar_q, y_true_s, anneal,
                       hyper_params["batch_size"])
    assert jnp.allclose(out, ref, rtol=1e-4, atol=1e-4), (out, ref)

    print("KERNEL_OK")
</pallas_src>

<mosaic_0001>
module attributes {stable_mosaic.version = 11 : i64} {
  func.func @_vae_loss_kernel(%arg0: i32, %arg1: memref<16x128xf32, #tpu.memory_space<vmem>>, %arg2: memref<16x128xf32, #tpu.memory_space<vmem>>, %arg3: memref<16x32xf32, #tpu.memory_space<vmem>>, %arg4: memref<16x32xf32, #tpu.memory_space<vmem>>, %arg5: memref<16x1xf32, #tpu.memory_space<vmem>>, %arg6: memref<16x1xf32, #tpu.memory_space<vmem>>) attributes {dimension_semantics = [#tpu.dimension_semantics<parallel>], iteration_bounds = array<i64: 1>, scalar_prefetch = 0 : i64, scratch_operands = 0 : i64, tpu.core_type = #tpu.core_type<tc>, window_params = [{transform_indices = @transform_0, window_bounds = array<i64: 16, 128>}, {transform_indices = @transform_1, window_bounds = array<i64: 16, 128>}, {transform_indices = @transform_2, window_bounds = array<i64: 16, 32>}, {transform_indices = @transform_3, window_bounds = array<i64: 16, 32>}, {transform_indices = @transform_4, window_bounds = array<i64: 16, 1>}, {transform_indices = @transform_5, window_bounds = array<i64: 16, 1>}]} {
    %c0 = arith.constant 0 : index
    %c0_0 = arith.constant 0 : index
    %0 = vector.load %arg1[%c0, %c0_0] : memref<16x128xf32, #tpu.memory_space<vmem>>, vector<16x128xf32>
    %c0_1 = arith.constant 0 : index
    %c0_2 = arith.constant 0 : index
    %1 = vector.load %arg2[%c0_1, %c0_2] : memref<16x128xf32, #tpu.memory_space<vmem>>, vector<16x128xf32>
    %cst = arith.constant dense<0xFF800000> : vector<16xf32>
    %2 = vector.multi_reduction <maximumf>, %0, %cst [1] : vector<16x128xf32> to vector<16xf32>
    %3 = vector.shape_cast %2 : vector<16xf32> to vector<16x1xf32>
    %4 = vector.broadcast %3 : vector<16x1xf32> to vector<16x128xf32>
    %5 = arith.subf %0, %4 : vector<16x128xf32>
    %6 = math.exp %5 : vector<16x128xf32>
    %cst_3 = arith.constant dense<0.000000e+00> : vector<16xf32>
    %7 = vector.multi_reduction <add>, %6, %cst_3 [1] : vector<16x128xf32> to vector<16xf32>
    %8 = vector.shape_cast %7 : vector<16xf32> to vector<16x1xf32>
    %9 = math.log %8 : vector<16x1xf32>
    %10 = vector.broadcast %9 : vector<16x1xf32> to vector<16x128xf32>
    %11 = arith.subf %5, %10 : vector<16x128xf32>
    %cst_4 = arith.constant 0.000000e+00 : f32
    %12 = vector.broadcast %cst_4 : f32 to vector<16x128xf32>
    %13 = arith.subf %12, %1 : vector<16x128xf32>
    %14 = arith.mulf %13, %11 : vector<16x128xf32>
    %cst_5 = arith.constant dense<0.000000e+00> : vector<16xf32>
    %15 = vector.multi_reduction <add>, %14, %cst_5 [1] : vector<16x128xf32> to vector<16xf32>
    %16 = vector.shape_cast %15 : vector<16xf32> to vector<16x1xf32>
    %c0_6 = arith.constant 0 : index
    %c0_7 = arith.constant 0 : index
    %17 = vector.load %arg5[%c0_6, %c0_7] : memref<16x1xf32, #tpu.memory_space<vmem>>, vector<16x1xf32>
    tpu.vector_store %arg5[%c0_6, %c0_7], %16 {strides = array<i32>} : memref<16x1xf32, #tpu.memory_space<vmem>>, vector<16x1xf32>,
    %c0_8 = arith.constant 0 : index
    %c0_9 = arith.constant 0 : index
    %18 = vector.load %arg4[%c0_8, %c0_9] : memref<16x32xf32, #tpu.memory_space<vmem>>, vector<16x32xf32>
    %c0_10 = arith.constant 0 : index
    %c0_11 = arith.constant 0 : index
    %19 = vector.load %arg3[%c0_10, %c0_11] : memref<16x32xf32, #tpu.memory_space<vmem>>, vector<16x32xf32>
    %cst_12 = arith.constant 0.000000e+00 : f32
    %20 = vector.broadcast %cst_12 : f32 to vector<16x32xf32>
    %21 = arith.subf %20, %18 : vector<16x32xf32>
    %22 = math.exp %18 : vector<16x32xf32>
    %23 = arith.addf %21, %22 : vector<16x32xf32>
    %24 = arith.mulf %19, %19 : vector<16x32xf32>
    %25 = arith.addf %23, %24 : vector<16x32xf32>
    %cst_13 = arith.constant 1.000000e+00 : f32
    %26 = vector.broadcast %cst_13 : f32 to vector<16x32xf32>
    %27 = arith.subf %25, %26 : vector<16x32xf32>
    %cst_14 = arith.constant 5.000000e-01 : f32
    %28 = vector.broadcast %cst_14 : f32 to vector<16x32xf32>
    %29 = arith.mulf %28, %27 : vector<16x32xf32>
    %cst_15 = arith.constant dense<0.000000e+00> : vector<16xf32>
    %30 = vector.multi_reduction <add>, %29, %cst_15 [1] : vector<16x32xf32> to vector<16xf32>
    %31 = vector.shape_cast %30 : vector<16xf32> to vector<16x1xf32>
    %c0_16 = arith.constant 0 : index
    %c0_17 = arith.constant 0 : index
    %32 = vector.load %arg6[%c0_16, %c0_17] : memref<16x1xf32, #tpu.memory_space<vmem>>, vector<16x1xf32>
    tpu.vector_store %arg6[%c0_16, %c0_17], %31 {strides = array<i32>} : memref<16x1xf32, #tpu.memory_space<vmem>>, vector<16x1xf32>,
    return
  }
  func.func @transform_0(%arg0: i32) -> (i32, i32) {
    %c0_i32 = arith.constant 0 : i32
    %c0_i32_0 = arith.constant 0 : i32
    return %arg0, %c0_i32 : i32, i32
  }
  func.func @transform_1(%arg0: i32) -> (i32, i32) {
    %c0_i32 = arith.constant 0 : i32
    %c0_i32_0 = arith.constant 0 : i32
    return %arg0, %c0_i32 : i32, i32
  }
  func.func @transform_2(%arg0: i32) -> (i32, i32) {
    %c0_i32 = arith.constant 0 : i32
    %c0_i32_0 = arith.constant 0 : i32
    return %arg0, %c0_i32 : i32, i32
  }
  func.func @transform_3(%arg0: i32) -> (i32, i32) {
    %c0_i32 = arith.constant 0 : i32
    %c0_i32_0 = arith.constant 0 : i32
    return %arg0, %c0_i32 : i32, i32
  }
  func.func @transform_4(%arg0: i32) -> (i32, i32) {
    %c0_i32 = arith.constant 0 : i32
    %c0_i32_0 = arith.constant 0 : i32
    return %arg0, %c0_i32 : i32, i32
  }
  func.func @transform_5(%arg0: i32) -> (i32, i32) {
    %c0_i32 = arith.constant 0 : i32
    %c0_i32_0 = arith.constant 0 : i32
    return %arg0, %c0_i32 : i32, i32
  }
}

</mosaic_0001>

<bundles_post_ra>
// kernel: tpu_custom_call.1
= control target key start
LH: loop header
LB: loop body
LE: loop exit
PB: predicated region body
PF: predicated region fallthrough
CT: control target
= control target key end

     0   :  { %11 = vsyncpa [#allocation3], 0  ;;  %s327_s0 = inlined_call_operand.hbm [shape: f32[16,128], index: 0, kind: input, shape index: {}]   ;;  %s328_s1 = inlined_call_operand.hbm [shape: f32[16,128], index: 1, kind: input, shape index: {}]   ;;  %s329_s2 = inlined_call_operand.hbm [shape: f32[16,32], index: 2, kind: input, shape index: {}]   ;;  %s330_s3 = inlined_call_operand.hbm [shape: f32[16,32], index: 3, kind: input, shape index: {}]   ;;  %s331_s4 = inlined_call_operand.vmem [shape: f32[16,1], index: 4, kind: output, shape index: {0}]   ;;  %s332_s5 = inlined_call_operand.vmem [shape: f32[16,1], index: 5, kind: output, shape index: {1}]  }
   0x1   :  { %12 = vsyncpa [#allocation5], 0 }
   0x2   :  { %13 = vsyncpa [#allocation8], 0  ;;  %s255_s18 = smov [#allocation4]   ;;  %s256_s20 = smov [#allocation2]  }
   0x3   :  { %s31_s19 = sshll.u32 %s255_s18, 4  ;;  %s19_s21 = sshll.u32 %s256_s20, 4  ;;  %s32_s19 = int_to_ptr.vmem [resolvable:$true] %s31_s19  ;;  %s20_s21 = int_to_ptr.vmem [resolvable:$true] %s19_s21 }
   0x4   :  { %s177_s22 = scalar_lea.vmem %s32_s19, 256  ;;  %p182_p1 = scmp.lt.s32.totalorder %s32_s19, %s32_s19 }
   0x5   :  { %p178_p0 = scmp.ne.s32.totalorder %s32_s19, %s177_s22  ;;  %p183_p2 = scmp.lt.s32.totalorder %s177_s22, %s177_s22 }
   0x7   :  { %p184_p3 = por %p183_p2, %p182_p1 }
   0x9   :  { %p185_p4 = pnand %p184_p3, %p178_p0 }
   0xb   :  { %188 = shalt.err (!%p185_p4)
}
   0xc   :  { %s257_s23 = smov 128   ;;  %s258_s24 = smov 8  }
   0xd   :  { %37 = dma.hbm_to_vmem [thread:$0]  %s328_s1, 256, %s32_s19, [#allocation5], %s257_s23, %s257_s23, %s258_s24  }
   0xe   :  { %s197_s27 = scalar_lea.vmem %s20_s21, 256  ;;  %p202_p6 = scmp.lt.s32.totalorder %s20_s21, %s20_s21 }
   0xf   :  { %p198_p5 = scmp.ne.s32.totalorder %s20_s21, %s197_s27  ;;  %p203_p7 = scmp.lt.s32.totalorder %s197_s27, %s197_s27 }
  0x11   :  { %p204_p8 = por %p203_p7, %p202_p6 }
  0x13   :  { %p205_p9 = pnand %p204_p8, %p198_p5 }
  0x15   :  { %208 = shalt.err (!%p205_p9)
}
  0x16   :  { %25 = dma.hbm_to_vmem [thread:$0]  %s327_s0, 256, %s20_s21, [#allocation3], %s257_s23, %s257_s23, %s258_s24  }
  0x17   :  { %s259_s30 = smov [#allocation6]   ;;  %s260_s7 = smov [#allocation7]  }
  0x18   :  { %s43_s6 = sshll.u32 %s259_s30, 4  ;;  %s55_s8 = sshll.u32 %s260_s7, 4  ;;  %s44_s6 = int_to_ptr.vmem [resolvable:$true] %s43_s6  ;;  %s56_s8 = int_to_ptr.vmem [resolvable:$true] %s55_s8 }
  0x19   :  { %s217_s1 = scalar_lea.vmem %s44_s6, 256  ;;  %p222_p11 = scmp.lt.s32.totalorder %s44_s6, %s44_s6 }
  0x1a   :  { %p218_p10 = scmp.ne.s32.totalorder %s44_s6, %s217_s1  ;;  %p223_p12 = scmp.lt.s32.totalorder %s217_s1, %s217_s1 }
  0x1c   :  { %p224_p13 = por %p223_p12, %p222_p11 }
  0x1e   :  { %p225_p0 = pnand %p224_p13, %p218_p10 }
  0x20   :  { %228 = shalt.err (!%p225_p0)
}
  0x21   :  { %49 = dma.hbm_to_vmem [thread:$0]  %s329_s2, 256, %s44_s6, [#allocation5], %s257_s23, %s257_s23, %s258_s24  }
  0x22   :  { %s237_s0 = scalar_lea.vmem %s56_s8, 256  ;;  %p242_p2 = scmp.lt.s32.totalorder %s56_s8, %s56_s8 }
  0x23   :  { %p238_p1 = scmp.ne.s32.totalorder %s56_s8, %s237_s0  ;;  %p243_p3 = scmp.lt.s32.totalorder %s237_s0, %s237_s0 }
  0x25   :  { %p244_p4 = por %p243_p3, %p242_p2 }
  0x27   :  { %p245_p5 = pnand %p244_p4, %p238_p1 }
  0x29   :  { %248 = shalt.err (!%p245_p5)
}
  0x2a   :  { %61 = dma.hbm_to_vmem [thread:$0]  %s330_s3, 256, %s56_s8, [#allocation8], %s257_s23, %s257_s23, %s258_s24  }
  0x2b   :  { %249 = dma.done.wait [#allocation3], 256  }
  0x2c   :  { %250 = vsyncadd [#allocation3], 4294967040 }
  0x2d   :  { %251 = dma.done.wait [#allocation5], 512  }
  0x2e   :  { %252 = vsyncadd [#allocation5], 4294966784 }
  0x2f   :  { %253 = dma.done.wait [#allocation8], 256  }
  0x30   :  { %254 = vsyncadd [#allocation8], 4294967040  ;;  %v74_v0 = vld [vmem:[#allocation2] sm:$0xff]  ;;  %v75_v1 = vld [vmem:[#allocation2 + $0x8] sm:$0xff]  ;;  %vm129_vm0 = vcmask 261120   ;;  %vm106_vm1 = vcmask 7168  }
  0x31   :  { %78 = vmax.xlane.f32.xlu0 %v74_v0  ;;  %v109_v10 = vld [vmem:[#allocation7] sm:$0xff]  ;;  %v110_v12 = vld [vmem:[#allocation7 + $0x8] sm:$0xff]  ;;  %v111_v17 = vld [vmem:[#allocation6] sm:$0xff] }
  0x32   :  { %v115_v11 = vmul.f32 1.442695, %v109_v10  ;;  %v117_v13 = vmul.f32 1.442695, %v110_v12  ;;  %v113_v15 = vsub.f32 0.0, %v109_v10  ;;  %v121_v20 = vmul.f32 %v111_v17, %v111_v17  ;;  %v112_v23 = vld [vmem:[#allocation6 + $0x8] sm:$0xff] }
  0x33   :  { %v114_v21 = vsub.f32 0.0, %v110_v12  ;;  %v122_v26 = vmul.f32 %v112_v23, %v112_v23  ;;  %v76_v27 = vld [vmem:[#allocation4] sm:$0xff]  ;;  %v77_v33 = vld [vmem:[#allocation4 + $0x8] sm:$0xff] }
  0x34   :  { %v98_v32 = vsub.f32 0.0, %v76_v27  ;;  %v99_v40 = vsub.f32 0.0, %v77_v33 }
  0x35   :  { %80 = vmax.xlane.f32.xlu0 %v75_v1 }
  0xba   :  { %v79_v2 = vpop.xlane.xlu0 %78 }
  0xbb   :  { %v82_v3 = vsub.f32 %v74_v0, %v79_v2 }
  0xbd   :  { %v84_v4 = vmul.f32 1.442695, %v82_v3 }
  0xbe   :  { %v81_v5 = vpop.xlane.xlu0 %80 }
  0xbf   :  { %v83_v6 = vsub.f32 %v75_v1, %v81_v5  ;;  %157 = vpow2.f32 %v84_v4 }
  0xc1   :  { %v86_v7 = vmul.f32 1.442695, %v83_v6 }
  0xc3   :  { %159 = vpow2.f32 %v86_v7 }
  0xc4   :  { %161 = vpow2.f32 %v115_v11 }
  0xc5   :  { %163 = vpow2.f32 %v117_v13 }
  0xcc   :  { %v158_v8 = vpop.eup %157 }
  0xcd   :  { %88 = vadd.xlane.f32.xlu1 %v158_v8 }
  0xd0   :  { %v160_v9 = vpop.eup %159 }
  0xd1   :  { %90 = vadd.xlane.f32.xlu1 %v160_v9  ;;  %v162_v16 = vpop.eup %161 }
  0xd2   :  { %v119_v19 = vadd.f32 %v162_v16, %v113_v15  ;;  %v164_v22 = vpop.eup %163 }
  0xd3   :  { %v120_v25 = vadd.f32 %v164_v22, %v114_v21 }
  0xd4   :  { %v123_v24 = vadd.f32 %v121_v20, %v119_v19 }
  0xd5   :  { %v124_v30 = vadd.f32 %v122_v26, %v120_v25 }
  0xd6   :  { %v149_v29 = vadd.f32 -1.0, %v123_v24 }
  0xd7   :  { %v150_v37 = vadd.f32 -1.0, %v124_v30 }
  0xd8   :  { %v127_v36 = vmul.f32 0.5, %v149_v29 }
  0xd9   :  { %v128_v43 = vmul.f32 0.5, %v150_v37 }
  0xda   :  { %v130_v42 = vsel %vm129_vm0, %v127_v36, 0.0 }
  0xdb   :  { %v133_v45 = vsel %vm129_vm0, %v128_v43, 0.0 }
 0x156   :  { %v89_v14 = vpop.xlane.xlu1 %88 }
 0x157   :  { %165 = vlog2.f32 %v89_v14 }
 0x15a   :  { %v91_v18 = vpop.xlane.xlu1 %90 }
 0x15b   :  { %167 = vlog2.f32 %v91_v18 }
 0x164   :  { %v166_v28 = vpop.eup %165 }
 0x165   :  { %v93_v31 = vmul.f32 0.6931472, %v166_v28 }
 0x167   :  { %v96_v34 = vsub.f32 %v82_v3, %v93_v31 }
 0x168   :  { %v168_v35 = vpop.eup %167 }
 0x169   :  { %v95_v38 = vmul.f32 0.6931472, %v168_v35  ;;  %v100_v39 = vmul.f32 %v98_v32, %v96_v34 }
 0x16b   :  { %102 = vadd.xlane.f32.xlu0 %v100_v39  ;;  %v97_v41 = vsub.f32 %v83_v6, %v95_v38 }
 0x16d   :  { %v101_v44 = vmul.f32 %v99_v40, %v97_v41 }
 0x16f   :  { %104 = vadd.xlane.f32.xlu1 %v101_v44  ;;  %131 = vadd.xlane.f32.xlu0 %v130_v42 }
 0x173   :  { %134 = vadd.xlane.f32.xlu1 %v133_v45 }
 0x1f4   :  { %v103_v46 = vpop.xlane.xlu0 %102 }
 0x1f5   :  { %107 = vst.msk [vmem:[%s331_s4] sm:$0xff] %vm106_vm1, %v103_v46 }
 0x1f8   :  { %v105_v47 = vpop.xlane.xlu1 %104  ;;  %v132_v48 = vpop.xlane.xlu0 %131 }
 0x1f9   :  { %108 = vst.msk [vmem:[%s331_s4 + $0x8] sm:$0xff] %vm106_vm1, %v105_v47  ;;  %136 = vst.msk [vmem:[%s332_s5] sm:$0xff] %vm106_vm1, %v132_v48 }
 0x1fc   :  { %v135_v49 = vpop.xlane.xlu1 %134 }
 0x1fd   :  { %137 = vst.msk [vmem:[%s332_s5 + $0x8] sm:$0xff] %vm106_vm1, %v135_v49 }
 0x1fe   :  { %146 = vsyncpa [#allocation3], 1 }
 0x1ff   :  { %147 = vsyncpa [#allocation5], 1 }
 0x200   :  { %148 = vsyncpa [#allocation8], 1 }

</bundles_post_ra>
